<compile_context>
chip_gen: v6e
topology: v6e:2x2x1
jax: 0.10.0
libtpu: 0.0.40
codegen_flags: <defaults>
</compile_context>

<pallas_src>
import functools

import jax
import jax.numpy as jnp
from jax import lax
from jax.experimental import pallas as pl
from jax.experimental.pallas import tpu as pltpu


NEG_INF = -1e30  # finite large-negative mask value (exp underflows cleanly)


def _pick_tile(dim, preferred, align):
    """Largest block size <= `preferred` that is either the full dim or an
    `align`-multiple divisor of `dim` (keeps every BlockSpec (8,128)-legal and
    the grid edge-free).  Only if no aligned divisor exists do we fall back to
    a single full-dim block."""
    if dim <= preferred:
        return dim
    t = (preferred // align) * align
    while t >= align:
        if dim % t == 0:
            return t
        t -= align
    return dim


# ----------------------------------------------------------------------------
# Kernel 1: tiled linear  y = activation(x @ w_t + b) (+ fused residual adds)
# ----------------------------------------------------------------------------
def _linear_kernel(x_ref, w_ref, b_ref, *rest, activation, num_residuals):
    res_refs = rest[:num_residuals]
    o_ref = rest[num_residuals]
    acc_ref = rest[num_residuals + 1]
    k = pl.program_id(2)

    @pl.when(k == 0)
    def _init():
        acc_ref[...] = jnp.zeros_like(acc_ref)

    acc_ref[...] += jnp.dot(x_ref[...], w_ref[...],
                            preferred_element_type=jnp.float32)

    @pl.when(k == pl.num_programs(2) - 1)
    def _finalize():
        y = acc_ref[...] + b_ref[...]              # (tm, tn) + (1, tn)
        if activation == "relu":
            y = jnp.maximum(y, 0.0)
        for r in res_refs:                          # fused residual adds
            y = y + r[...].astype(jnp.float32)
        o_ref[...] = y.astype(o_ref.dtype)


def linear(x2d, w_t, b=None, *, activation=None, residuals=(),
           compute_dtype=jnp.bfloat16, out_dtype=jnp.float32,
           tm=256, tn=256, tk=512, vmem_limit_bytes=None):
    """x2d: (M, K); w_t: (K, N) pre-transposed; b: (N,) or None.

    `residuals` is a tuple of (M, N) arrays added in the epilogue (they share
    the output BlockSpec, so each tile is fetched once per output block).
    bf16 inputs halve HBM bytes and roughly double MXU throughput; the
    accumulator and epilogue stay f32.  Raise vmem_limit_bytes (e.g. 48-64 MiB
    on v6e) when sweeping tm/tn/tk upward.
    """
    M, K = x2d.shape
    K2, N = w_t.shape
    assert K == K2
    x2d = x2d.astype(compute_dtype)
    w_t = w_t.astype(compute_dtype)
    b2d = (jnp.zeros((1, N), jnp.float32) if b is None
           else b.reshape(1, N).astype(jnp.float32))
    residuals = tuple(residuals)

    tm = _pick_tile(M, tm, 8)
    tn = _pick_tile(N, tn, 128)
    tk = _pick_tile(K, tk, 128)
    grid = (M // tm, N // tn, K // tk)

    in_specs = [pl.BlockSpec((tm, tk), lambda i, j, k: (i, k)),
                pl.BlockSpec((tk, tn), lambda i, j, k: (k, j)),
                pl.BlockSpec((1, tn), lambda i, j, k: (0, j))]
    in_specs += [pl.BlockSpec((tm, tn), lambda i, j, k: (i, j))
                 for _ in residuals]

    itm = jnp.dtype(compute_dtype).itemsize
    cost = pl.CostEstimate(
        flops=2 * M * N * K,
        transcendentals=0,
        bytes_accessed=itm * (M * K + K * N) + 4 * (M * N * (1 + len(residuals)) + N),
    )
    return pl.pallas_call(
        functools.partial(_linear_kernel, activation=activation,
                          num_residuals=len(residuals)),
        out_shape=jax.ShapeDtypeStruct((M, N), out_dtype),
        grid=grid,
        in_specs=in_specs,
        out_specs=pl.BlockSpec((tm, tn), lambda i, j, k: (i, j)),
        scratch_shapes=[pltpu.VMEM((tm, tn), jnp.float32)],
        compiler_params=pltpu.CompilerParams(
            dimension_semantics=("parallel", "parallel", "arbitrary"),
            vmem_limit_bytes=vmem_limit_bytes),
        cost_estimate=cost,
    )(x2d, w_t, b2d, *residuals)


# ----------------------------------------------------------------------------
# Kernel 2: fused QKV projection -> (3, M, C) with [Q | K | V] on the lead axis
# (per-head columns contiguous inside each section).  This layout lets the
# attention kernel fetch Q / K / V as separate C-wide lane-dense blocks.
# ----------------------------------------------------------------------------
def _qkv_proj_kernel(x_ref, w_ref, o_ref, acc_ref):
    k = pl.program_id(2)

    @pl.when(k == 0)
    def _init():
        acc_ref[...] = jnp.zeros_like(acc_ref)

    acc_ref[...] += jnp.dot(x_ref[...], w_ref[...],
                            preferred_element_type=jnp.float32)

    @pl.when(k == pl.num_programs(2) - 1)
    def _finalize():
        o_ref[...] = acc_ref[...].astype(o_ref.dtype)


def qkv_project(x2d, w3, *, compute_dtype=jnp.bfloat16, out_dtype=jnp.bfloat16,
                tm=256, tk=512, vmem_limit_bytes=None):
    """x2d: (M, E); w3: (3, E, C) sections [Q, K, V].  Returns (3, M, C)."""
    M, E = x2d.shape
    three, E2, C = w3.shape
    assert three == 3 and E == E2
    x2d = x2d.astype(compute_dtype)
    w3 = w3.astype(compute_dtype)
    tm = _pick_tile(M, tm, 8)
    tk = _pick_tile(E, tk, 128)
    grid = (3, M // tm, E // tk)

    itm = jnp.dtype(compute_dtype).itemsize
    cost = pl.CostEstimate(
        flops=2 * 3 * M * C * E, transcendentals=0,
        bytes_accessed=itm * (3 * M * E + 3 * E * C)
        + jnp.dtype(out_dtype).itemsize * 3 * M * C)
    return pl.pallas_call(
        _qkv_proj_kernel,
        out_shape=jax.ShapeDtypeStruct((3, M, C), out_dtype),
        grid=grid,
        in_specs=[pl.BlockSpec((tm, tk), lambda s, i, k: (i, k)),
                  pl.BlockSpec((None, tk, C), lambda s, i, k: (s, k, 0))],
        out_specs=pl.BlockSpec((None, tm, C), lambda s, i, k: (s, i, 0)),
        scratch_shapes=[pltpu.VMEM((tm, C), jnp.float32)],
        compiler_params=pltpu.CompilerParams(
            dimension_semantics=("parallel", "parallel", "arbitrary"),
            vmem_limit_bytes=vmem_limit_bytes),
        cost_estimate=cost,
    )(x2d, w3)


# ----------------------------------------------------------------------------
# Kernel 3: LayerNorm over the last (embedding) axis.
# ----------------------------------------------------------------------------
def _layernorm_kernel(x_ref, g_ref, b_ref, o_ref, *, eps):
    x = x_ref[...]
    mean = jnp.mean(x, axis=-1, keepdims=True)
    xc = x - mean
    var = jnp.mean(xc * xc, axis=-1, keepdims=True)
    y = xc * lax.rsqrt(var + eps)
    o_ref[...] = (y * g_ref[...] + b_ref[...]).astype(o_ref.dtype)


def layer_norm(x2d, gamma, beta, *, eps=1e-5, tm=256, out_dtype=jnp.float32):
    M, C = x2d.shape
    tm = _pick_tile(M, tm, 8)
    return pl.pallas_call(
        functools.partial(_layernorm_kernel, eps=eps),
        out_shape=jax.ShapeDtypeStruct((M, C), out_dtype),
        grid=(M // tm,),
        in_specs=[
            pl.BlockSpec((tm, C), lambda i: (i, 0)),
            pl.BlockSpec((1, C), lambda i: (0, 0)),
            pl.BlockSpec((1, C), lambda i: (0, 0)),
        ],
        out_specs=pl.BlockSpec((tm, C), lambda i: (i, 0)),
        compiler_params=pltpu.CompilerParams(dimension_semantics=("parallel",)),
    )(x2d.astype(jnp.float32), gamma.reshape(1, C).astype(jnp.float32),
      beta.reshape(1, C).astype(jnp.float32))


# ----------------------------------------------------------------------------
# Kernel 4: flash-style causal multi-head attention with fused residual add.
#   grid = (B, q_tiles, kv_tiles); lane-dense (t, C) accumulator and output.
# ----------------------------------------------------------------------------
def _flash_attn_kernel(q_ref, k_ref, v_ref, res_ref, o_ref,
                       m_ref, l_ref, acc_ref, *,
                       num_heads, head_size, tq, tkv, approx_recip):
    qi = pl.program_id(1)
    ki = pl.program_id(2)
    H, c = num_heads, head_size
    inv_scale = 1.0 / (float(head_size) ** 0.5)

    @pl.when(ki == 0)
    def _init():
        m_ref[...] = jnp.full_like(m_ref, NEG_INF)
        l_ref[...] = jnp.zeros_like(l_ref)
        acc_ref[...] = jnp.zeros_like(acc_ref)

    def _accumulate(mask_diag):
        if mask_diag:
            # Only the diagonal block needs the mask (tq == tkv, qi == ki here),
            # so local row/col indices suffice — no (T,T) mask tensor anywhere.
            rows = lax.broadcasted_iota(jnp.int32, (tq, tkv), 0)
            cols = lax.broadcasted_iota(jnp.int32, (tq, tkv), 1)
            visible = rows >= cols
        for h in range(H):                       # static unrolled loop over heads
            sl = slice(h * c, (h + 1) * c)       # contiguous per-head columns
            q = q_ref[:, sl] * inv_scale         # fold 1/sqrt(c) into the (tq,c) tile
            k = k_ref[:, sl]
            v = v_ref[:, sl]
            # Contract last dims — no explicit K transpose.
            s = lax.dot_general(q, k, (((1,), (1,)), ((), ())),
                                preferred_element_type=jnp.float32)
            if mask_diag:
                s = jnp.where(visible, s, NEG_INF)
            m_prev = m_ref[h]                    # (tq, 1) f32 stats
            m_new = jnp.maximum(m_prev, jnp.max(s, axis=-1, keepdims=True))
            alpha = jnp.exp(m_prev - m_new)
            p = jnp.exp(s - m_new)
            l_ref[h] = alpha * l_ref[h] + jnp.sum(p, axis=-1, keepdims=True)
            acc_ref[:, sl] = alpha * acc_ref[:, sl] + jnp.dot(
                p.astype(v.dtype), v, preferred_element_type=jnp.float32)
            m_ref[h] = m_new

    @pl.when(ki < qi)          # fully visible block: no mask work at all
    def _full():
        _accumulate(mask_diag=False)

    @pl.when(ki == qi)         # diagonal block: apply the causal mask
    def _diag():
        _accumulate(mask_diag=True)

    @pl.when(ki == pl.num_programs(2) - 1)
    def _finalize():
        for h in range(H):
            sl = slice(h * c, (h + 1) * c)
            inv_l = pl.reciprocal(l_ref[h], approx=approx_recip)
            acc_ref[:, sl] = acc_ref[:, sl] * inv_l
        # Single lane-dense (tq, C) store with the residual add fused in.
        o_ref[...] = (acc_ref[...] + res_ref[...].astype(jnp.float32)).astype(o_ref.dtype)


def causal_attention(qkv3, residual, num_heads, head_size, *, tile=256,
                     approx_recip=True, vmem_limit_bytes=None):
    """qkv3: (3, B, T, C) sections [Q, K, V], per-head contiguous columns.
    residual: (B, T, C) f32 stream added in the epilogue.
    Returns (B, T, C) f32 = attention(qkv) + residual, merged-head layout.
    """
    _, B, T, C = qkv3.shape
    t = _pick_tile(T, tile, 8)     # same tile for q and kv (causal skip needs tq == tkv)
    nq = T // t
    itm = jnp.dtype(qkv3.dtype).itemsize

    cost = pl.CostEstimate(
        flops=4 * B * T * T * C,                        # QK^T + PV (upper bound)
        transcendentals=B * num_heads * T * T,
        bytes_accessed=itm * B * T * C * (1 + nq) + 4 * 2 * B * T * C,
    )
    kernel = functools.partial(_flash_attn_kernel, num_heads=num_heads,
                               head_size=head_size, tq=t, tkv=t,
                               approx_recip=approx_recip)
    # K/V index maps clamp the kv block index so blocks above the causal
    # diagonal re-return the previous block and issue NO DMA.
    q_spec = pl.BlockSpec((None, None, t, C), lambda b, qi, ki: (0, b, qi, 0))
    k_spec = pl.BlockSpec((None, None, t, C),
                          lambda b, qi, ki: (1, b, jnp.minimum(ki, qi), 0))
    v_spec = pl.BlockSpec((None, None, t, C),
                          lambda b, qi, ki: (2, b, jnp.minimum(ki, qi), 0))
    r_spec = pl.BlockSpec((None, t, C), lambda b, qi, ki: (b, qi, 0))

    return pl.pallas_call(
        kernel,
        out_shape=jax.ShapeDtypeStruct((B, T, C), jnp.float32),
        grid=(B, nq, nq),
        in_specs=[q_spec, k_spec, v_spec, r_spec],
        out_specs=pl.BlockSpec((None, t, C), lambda b, qi, ki: (b, qi, 0)),
        scratch_shapes=[
            pltpu.VMEM((num_heads, t, 1), jnp.float32),   # m (f32 stats)
            pltpu.VMEM((num_heads, t, 1), jnp.float32),   # l (f32 stats)
            pltpu.VMEM((t, C), jnp.float32),              # lane-dense acc
        ],
        compiler_params=pltpu.CompilerParams(
            dimension_semantics=("parallel", "parallel", "arbitrary"),
            vmem_limit_bytes=vmem_limit_bytes),
        cost_estimate=cost,
    )(qkv3, qkv3, qkv3, residual)


# ----------------------------------------------------------------------------
# Module wrappers (parameters + composition; all heavy math in Pallas kernels).
# Weights are stored pre-transposed: (in_features, out_features).
# ----------------------------------------------------------------------------
def _uniform(key, shape, bound):
    return jax.random.uniform(key, shape, jnp.float32, -bound, bound)


class MultiHeadedCausalSelfAttentionPallas:
    def __init__(self, embed_size, max_context_length, num_heads, key):
        if embed_size % num_heads:
            raise ValueError("num_heads must divide embed_size")
        self.num_heads = num_heads
        self.head_size = embed_size // num_heads
        self.embed_size = embed_size
        self.max_context_length = max_context_length
        bound = 1.0 / (embed_size ** 0.5)
        # PyTorch layout: nn.Linear(E, 3E, bias=False).weight.T -> (E, 3E) with
        # per-head interleaved [q|k|v] columns.  Kept for the reference path.
        self.w_qkv_t = _uniform(key, (embed_size, 3 * embed_size), bound)
        # Free init-time permutation to sections [Q_all | K_all | V_all] stacked
        # on a leading axis: (3, E, C), per-head contiguous inside each section.
        E, H, c = embed_size, num_heads, self.head_size
        self.w_qkv_split = (self.w_qkv_t
                            .reshape(E, H, 3, c)
                            .transpose(2, 0, 1, 3)       # (3, E, H, c)
                            .reshape(3, E, E))
        # causal mask is generated inside the attention kernel (no buffer).

    def __call__(self, x_norm, residual, *, compute_dtype):
        B, T, C = x_norm.shape
        qkv = qkv_project(x_norm.reshape(B * T, C), self.w_qkv_split,
                          compute_dtype=compute_dtype, out_dtype=compute_dtype)
        qkv = qkv.reshape(3, B, T, C)     # free: row-major split of M = B*T
        return causal_attention(qkv, residual, self.num_heads, self.head_size,
                                approx_recip=(compute_dtype != jnp.float32))


class TransformerBlockPallas:
    def __init__(self, embed_size, mlp_size, max_context_length, num_heads, key):
        k_attn, k_w1, k_b1, k_w2, k_b2 = jax.random.split(key, 5)
        self.attn = MultiHeadedCausalSelfAttentionPallas(
            embed_size, max_context_length, num_heads, k_attn)
        b1 = 1.0 / (embed_size ** 0.5)
        b2 = 1.0 / (mlp_size ** 0.5)
        self.w1_t = _uniform(k_w1, (embed_size, mlp_size), b1)
        self.b1 = _uniform(k_b1, (mlp_size,), b1)
        self.w2_t = _uniform(k_w2, (mlp_size, embed_size), b2)
        self.b2 = _uniform(k_b2, (embed_size,), b2)
        self.ln0_g = jnp.ones((embed_size,), jnp.float32)
        self.ln0_b = jnp.zeros((embed_size,), jnp.float32)
        self.ln1_g = jnp.ones((embed_size,), jnp.float32)
        self.ln1_b = jnp.zeros((embed_size,), jnp.float32)

    def __call__(self, x, *, compute_dtype):
        """Returns x + block_torch(x): the DecodeTransformer outer residual is
        fused into this block's last linear epilogue."""
        B, T, C = x.shape
        x2 = x.reshape(B * T, C)
        h0 = layer_norm(x2, self.ln0_g, self.ln0_b, out_dtype=compute_dtype)
        # a = x + attention(LN0(x))   (residual fused into the attention kernel)
        a = self.attn(h0.reshape(B, T, C), x, compute_dtype=compute_dtype)
        a2 = a.reshape(B * T, C)
        h1 = layer_norm(a2, self.ln1_g, self.ln1_b, out_dtype=compute_dtype)
        m = linear(h1, self.w1_t, self.b1, activation="relu",
                   compute_dtype=compute_dtype, out_dtype=compute_dtype)
        # new_x = MLP(LN1(a)) + a + x   (both residuals fused into the epilogue)
        out = linear(m, self.w2_t, self.b2, residuals=(a2, x2),
                     compute_dtype=compute_dtype, out_dtype=jnp.float32)
        return out.reshape(B, T, C)


class DecodeTransformerPallas:
    def __init__(self, max_context_length, alphabet_size, embed_size, mlp_size,
                 num_heads, num_layers, key):
        keys = jax.random.split(key, 4 + num_layers)
        bt = 1.0 / (alphabet_size ** 0.5)
        bp = 1.0 / (max_context_length ** 0.5)
        bu = 1.0 / (embed_size ** 0.5)
        self.w_tok_t = _uniform(keys[0], (alphabet_size, embed_size), bt)      # (V, E)
        self.w_pos = _uniform(keys[1], (embed_size, max_context_length), bp)   # (E, Tmax)
        self.w_unemb_t = _uniform(keys[2], (embed_size, alphabet_size), bu)
        self.b_unemb = _uniform(keys[3], (alphabet_size,), bu)
        self.blocks = [
            TransformerBlockPallas(embed_size, mlp_size, max_context_length,
                                   num_heads, keys[4 + i])
            for i in range(num_layers)
        ]
        self.lnf_g = jnp.ones((embed_size,), jnp.float32)
        self.lnf_b = jnp.zeros((embed_size,), jnp.float32)
        self.max_context_length = max_context_length
        self.embed_size = embed_size
        self.alphabet_size = alphabet_size

    def __call__(self, tok_ids, *, compute_dtype):
        B, T = tok_ids.shape
        if T > self.max_context_length:
            raise ValueError(f"too many tokens! {T} > {self.max_context_length}")
        E = self.embed_size
        # Row gather == one-hot @ W.T, without materializing the one-hot or a
        # dense (B*T, 128) x (128, E) matmul.
        x_sem = jnp.take(self.w_tok_t, tok_ids, axis=0)          # (B, T, E)
        x = x_sem + self.w_pos.T[:T, :][None, :, :]
        for block in self.blocks:
            x = block(x, compute_dtype=compute_dtype)             # outer residual fused
        y = layer_norm(x.reshape(B * T, E), self.lnf_g, self.lnf_b,
                       out_dtype=compute_dtype)
        y = linear(y, self.w_unemb_t, self.b_unemb,
                   compute_dtype=compute_dtype, out_dtype=jnp.float32)
        return y.reshape(B, T, self.alphabet_size)


class ByteTransformerPallas:
    def __init__(self, max_context_length, embed_size, mlp_size, num_heads,
                 num_layers, key, compute_dtype=jnp.bfloat16):
        self.max_context_length = max_context_length
        self.compute_dtype = compute_dtype
        self.decode_transformer = DecodeTransformerPallas(
            max_context_length, 128, embed_size, mlp_size, num_heads, num_layers, key)

    def __call__(self, bytes_, compute_dtype=None):
        cd = self.compute_dtype if compute_dtype is None else compute_dtype
        return self.decode_transformer(bytes_, compute_dtype=cd)

    # TODO(synk): `complete()` autoregressive sampling loop (torch.multinomial)
    # is host-side control flow, not a kernel; intentionally not translated.


# ----------------------------------------------------------------------------
# Pure-JAX reference (mirrors the PyTorch ops exactly) for verification.
# ----------------------------------------------------------------------------
def _ref_layernorm(x, g, b, eps=1e-5):
    mu = x.mean(-1, keepdims=True)
    var = ((x - mu) ** 2).mean(-1, keepdims=True)
    return (x - mu) / jnp.sqrt(var + eps) * g + b


def _ref_attention(attn, x):
    B, T, C = x.shape
    H, c = attn.num_heads, attn.head_size
    qkv = (x @ attn.w_qkv_t).reshape(B, T, H, 3 * c).transpose(0, 2, 1, 3)
    q, k, v = qkv[..., :c], qkv[..., c:2 * c], qkv[..., 2 * c:]
    mask = jnp.log(jnp.tril(jnp.ones((T, T), jnp.float32)))
    s = jnp.einsum("bhqc,bhkc->bhqk", q, k) / (c ** 0.5) + mask
    p = jax.nn.softmax(s, axis=-1)
    y = jnp.einsum("bhqk,bhkc->bhqc", p, v)
    return y.transpose(0, 2, 1, 3).reshape(B, T, C)


def _ref_block(blk, x):
    x = x + _ref_attention(blk.attn, _ref_layernorm(x, blk.ln0_g, blk.ln0_b))
    h = _ref_layernorm(x, blk.ln1_g, blk.ln1_b)
    m = jnp.maximum(h @ blk.w1_t + blk.b1, 0.0) @ blk.w2_t + blk.b2
    return x + m


def _reference_forward(model, bytes_):
    toks = jnp.eye(128, dtype=jnp.float32)[bytes_]
    dt = model.decode_transformer
    B, T, V = toks.shape
    x = toks @ dt.w_tok_t + dt.w_pos.T[:T, :][None]
    for blk in dt.blocks:
        x = x + _ref_block(blk, x)
    y = _ref_layernorm(x, dt.lnf_g, dt.lnf_b)
    return y @ dt.w_unemb_t + dt.b_unemb


if __name__ == "__main__":
    max_context_length, embed_size, mlp_size, num_heads, num_layers = 16, 32, 64, 4, 2
    B, T = 2, 8

    key = jax.random.PRNGKey(0)
    k_param, k_data = jax.random.split(key)

    model = ByteTransformerPallas(max_context_length, embed_size, mlp_size,
                                  num_heads, num_layers, k_param)
    bytes_ = jax.random.randint(k_data, (B, T), 0, 128, dtype=jnp.int32)

    with jax.default_matmul_precision("highest"):
        ref = _reference_forward(model, bytes_)
    ref = jax.block_until_ready(ref)

    # Exact-parity mode: f32 through the MXU, exact reciprocal.
    logits_f32 = jax.block_until_ready(model(bytes_, compute_dtype=jnp.float32))
    assert logits_f32.shape == (B, T, 128), logits_f32.shape
    max_diff = float(jnp.max(jnp.abs(logits_f32 - ref)))
    assert jnp.allclose(logits_f32, ref, atol=2e-4, rtol=2e-4), \
        f"f32 mismatch, max diff {max_diff}"

    # Fast (default) mode: bf16 MXU inputs, f32 accumulation / softmax / stream.
    logits_bf16 = jax.block_until_ready(model(bytes_))
    assert logits_bf16.shape == (B, T, 128), logits_bf16.shape
    bf16_diff = float(jnp.max(jnp.abs(logits_bf16 - ref)))
    assert bf16_diff < 0.25, f"bf16 path diverged, max diff {bf16_diff}"

    print("KERNEL_OK")
</pallas_src>

<mosaic_0001>
module attributes {stable_mosaic.version = 11 : i64} {
  func.func @_layernorm_kernel(%arg0: i32, %arg1: memref<16x32xf32, #tpu.memory_space<vmem>>, %arg2: memref<1x32xf32, #tpu.memory_space<vmem>>, %arg3: memref<1x32xf32, #tpu.memory_space<vmem>>, %arg4: memref<16x32xf32, #tpu.memory_space<vmem>>) attributes {dimension_semantics = [#tpu.dimension_semantics<parallel>], iteration_bounds = array<i64: 1>, scalar_prefetch = 0 : i64, scratch_operands = 0 : i64, tpu.core_type = #tpu.core_type<tc>, window_params = [{transform_indices = @transform_0, window_bounds = array<i64: 16, 32>}, {pipeline_mode = #tpu.pipeline_mode<synchronous>, transform_indices = @transform_1, window_bounds = array<i64: 1, 32>}, {pipeline_mode = #tpu.pipeline_mode<synchronous>, transform_indices = @transform_2, window_bounds = array<i64: 1, 32>}, {transform_indices = @transform_3, window_bounds = array<i64: 16, 32>}]} {
    %c0 = arith.constant 0 : index
    %c0_0 = arith.constant 0 : index
    %0 = vector.load %arg1[%c0, %c0_0] : memref<16x32xf32, #tpu.memory_space<vmem>>, vector<16x32xf32>
    %cst = arith.constant dense<0.000000e+00> : vector<16xf32>
    %1 = vector.multi_reduction <add>, %0, %cst [1] : vector<16x32xf32> to vector<16xf32>
    %2 = vector.shape_cast %1 : vector<16xf32> to vector<16x1xf32>
    %cst_1 = arith.constant 3.200000e+01 : f32
    %3 = vector.broadcast %cst_1 : f32 to vector<16x1xf32>
    %4 = arith.divf %2, %3 : vector<16x1xf32>
    %5 = vector.broadcast %4 : vector<16x1xf32> to vector<16x32xf32>
    %6 = arith.subf %0, %5 : vector<16x32xf32>
    %7 = arith.mulf %6, %6 : vector<16x32xf32>
    %cst_2 = arith.constant dense<0.000000e+00> : vector<16xf32>
    %8 = vector.multi_reduction <add>, %7, %cst_2 [1] : vector<16x32xf32> to vector<16xf32>
    %9 = vector.shape_cast %8 : vector<16xf32> to vector<16x1xf32>
    %cst_3 = arith.constant 3.200000e+01 : f32
    %10 = vector.broadcast %cst_3 : f32 to vector<16x1xf32>
    %11 = arith.divf %9, %10 : vector<16x1xf32>
    %cst_4 = arith.constant 9.99999974E-6 : f32
    %12 = vector.broadcast %cst_4 : f32 to vector<16x1xf32>
    %13 = arith.addf %11, %12 : vector<16x1xf32>
    %14 = math.rsqrt %13 : vector<16x1xf32>
    %15 = vector.broadcast %14 : vector<16x1xf32> to vector<16x32xf32>
    %16 = arith.mulf %6, %15 : vector<16x32xf32>
    %c0_5 = arith.constant 0 : index
    %c0_6 = arith.constant 0 : index
    %17 = vector.load %arg2[%c0_5, %c0_6] : memref<1x32xf32, #tpu.memory_space<vmem>>, vector<1x32xf32>
    %18 = vector.broadcast %17 : vector<1x32xf32> to vector<16x32xf32>
    %19 = arith.mulf %16, %18 : vector<16x32xf32>
    %c0_7 = arith.constant 0 : index
    %c0_8 = arith.constant 0 : index
    %20 = vector.load %arg3[%c0_7, %c0_8] : memref<1x32xf32, #tpu.memory_space<vmem>>, vector<1x32xf32>
    %21 = vector.broadcast %20 : vector<1x32xf32> to vector<16x32xf32>
    %22 = arith.addf %19, %21 : vector<16x32xf32>
    %c0_9 = arith.constant 0 : index
    %c0_10 = arith.constant 0 : index
    %23 = vector.load %arg4[%c0_9, %c0_10] : memref<16x32xf32, #tpu.memory_space<vmem>>, vector<16x32xf32>
    tpu.vector_store %arg4[%c0_9, %c0_10], %22 {strides = array<i32>} : memref<16x32xf32, #tpu.memory_space<vmem>>, vector<16x32xf32>,
    return
  }
  func.func @transform_0(%arg0: i32) -> (i32, i32) {
    %c0_i32 = arith.constant 0 : i32
    %c0_i32_0 = arith.constant 0 : i32
    return %arg0, %c0_i32 : i32, i32
  }
  func.func @transform_1(%arg0: i32) -> (i32, i32) {
    %c0_i32 = arith.constant 0 : i32
    %c0_i32_0 = arith.constant 0 : i32
    %c0_i32_1 = arith.constant 0 : i32
    return %c0_i32, %c0_i32_0 : i32, i32
  }
  func.func @transform_2(%arg0: i32) -> (i32, i32) {
    %c0_i32 = arith.constant 0 : i32
    %c0_i32_0 = arith.constant 0 : i32
    %c0_i32_1 = arith.constant 0 : i32
    return %c0_i32, %c0_i32_0 : i32, i32
  }
  func.func @transform_3(%arg0: i32) -> (i32, i32) {
    %c0_i32 = arith.constant 0 : i32
    %c0_i32_0 = arith.constant 0 : i32
    return %arg0, %c0_i32 : i32, i32
  }
}

</mosaic_0001>

<bundles_post_ra>
// kernel: tpu_custom_call.1
= control target key start
LH: loop header
LB: loop body
LE: loop exit
PB: predicated region body
PF: predicated region fallthrough
CT: control target
= control target key end

     0   :  { %8 = vsyncpa [#allocation3], 0  ;;  %s198_s0 = inlined_call_operand.hbm [shape: f32[16,32], index: 0, kind: input, shape index: {}]   ;;  %s199_s1 = inlined_call_operand.vmem [shape: f32[1,32], index: 1, kind: input, shape index: {}]   ;;  %s200_s2 = inlined_call_operand.vmem [shape: f32[1,32], index: 2, kind: input, shape index: {}]   ;;  %s201_s3 = inlined_call_operand.hbm [shape: f32[16,32], index: 3, kind: output, shape index: {}]  }
   0x1   :  { %9 = vsyncpa [#allocation4], 0  ;;  %s150_s12 = smov [#allocation2]  }
   0x2   :  { %s15_s13 = sshll.u32 %s150_s12, 4  ;;  %s16_s13 = int_to_ptr.vmem [resolvable:$true] %s15_s13 }
   0x3   :  { %s114_s14 = scalar_lea.vmem %s16_s13, 256  ;;  %p119_p1 = scmp.lt.s32.totalorder %s16_s13, %s16_s13 }
   0x4   :  { %p115_p0 = scmp.ne.s32.totalorder %s16_s13, %s114_s14  ;;  %p120_p2 = scmp.lt.s32.totalorder %s114_s14, %s114_s14 }
   0x6   :  { %p121_p3 = por %p120_p2, %p119_p1 }
   0x8   :  { %p122_p4 = pnand %p121_p3, %p115_p0 }
   0xa   :  { %125 = shalt.err (!%p122_p4)
}
   0xb   :  { %s151_s15 = smov 128   ;;  %s152_s16 = smov 8  }
   0xc   :  { %21 = dma.hbm_to_vmem [thread:$0]  %s198_s0, 256, %s16_s13, [#allocation3], %s151_s15, %s151_s15, %s152_s16  }
   0xd   :  { %146 = dma.done.wait [#allocation3], 256  }
   0xe   :  { %147 = vsyncadd [#allocation3], 4294967040  ;;  %vm31_vm0 = vcmask 261120   ;;  %v29_v0 = vld [vmem:[#allocation2] sm:$0xff]  ;;  %v30_v1 = vld [vmem:[#allocation2 + $0x8] sm:$0xff]  ;;  %s153_s22 = smov [#allocation5]  }
   0xf   :  { %v32_v2 = vsel %vm31_vm0, %v29_v0, 0.0  ;;  %v35_v3 = vsel %vm31_vm0, %v30_v1, 0.0  ;;  %v96_v21 = vld [vmem:[%s199_s1] ss:$0 sm:$0xff]  ;;  %s84_s23 = sshll.u32 %s153_s22, 4  ;;  %s85_s23 = int_to_ptr.vmem [resolvable:$true] %s84_s23 }
  0x10   :  { %33 = vadd.xlane.f32.xlu0 %v32_v2  ;;  %v97_v23 = vld [vmem:[%s200_s2] ss:$0 sm:$0xff]  ;;  %s126_s24 = scalar_lea.vmem %s85_s23, 256  ;;  %p131_p6 = scmp.lt.s32.totalorder %s85_s23, %s85_s23 }
  0x11   :  { %p127_p5 = scmp.ne.s32.totalorder %s85_s23, %s126_s24  ;;  %p132_p7 = scmp.lt.s32.totalorder %s126_s24, %s126_s24 }
  0x13   :  { %p133_p8 = por %p132_p7, %p131_p6 }
  0x14   :  { %36 = vadd.xlane.f32.xlu0 %v35_v3 }
  0x15   :  { %p134_p9 = pnand %p133_p8, %p127_p5 }
  0x99   :  { %v34_v4 = vpop.xlane.xlu0 %33 }
  0x9a   :  { %v39_v5 = vmul.f32 0.03125, %v34_v4 }
  0x9c   :  { %v41_v6 = vsub.f32 %v29_v0, %v39_v5 }
  0x9d   :  { %v37_v7 = vpop.xlane.xlu0 %36 }
  0x9e   :  { %v40_v8 = vmul.f32 0.03125, %v37_v7  ;;  %v43_v9 = vmul.f32 %v41_v6, %v41_v6 }
  0xa0   :  { %v42_v10 = vsub.f32 %v30_v1, %v40_v8  ;;  %v45_v11 = vsel %vm31_vm0, %v43_v9, 0.0 }
  0xa1   :  { %46 = vadd.xlane.f32.xlu1 %v45_v11 }
  0xa2   :  { %v44_v12 = vmul.f32 %v42_v10, %v42_v10 }
  0xa4   :  { %v48_v13 = vsel %vm31_vm0, %v44_v12, 0.0 }
  0xa5   :  { %49 = vadd.xlane.f32.xlu1 %v48_v13 }
 0x12a   :  { %v47_v14 = vpop.xlane.xlu1 %46 }
 0x12b   :  { %v51_v15 = vmul.f32 0.03125, %v47_v14 }
 0x12d   :  { %v53_v16 = vadd.f32 1e-05, %v51_v15 }
 0x12e   :  { %v50_v17 = vpop.xlane.xlu1 %49 }
 0x12f   :  { %102 = vrsqrt.f32 %v53_v16  ;;  %v52_v18 = vmul.f32 0.03125, %v50_v17 }
 0x131   :  { %v54_v19 = vadd.f32 1e-05, %v52_v18 }
 0x133   :  { %104 = vrsqrt.f32 %v54_v19 }
 0x13c   :  { %v103_v20 = vpop.eup %102 }
 0x13d   :  { %v57_v22 = vmul.f32 %v103_v20, %v41_v6 }
 0x13f   :  { %v66_v24 = vmul.f32 %v96_v21, %v57_v22 }
 0x140   :  { %v105_v25 = vpop.eup %104 }
 0x141   :  { %v58_v26 = vmul.f32 %v105_v25, %v42_v10  ;;  %v75_v27 = vadd.f32 %v97_v23, %v66_v24 }
 0x143   :  { %v67_v28 = vmul.f32 %v96_v21, %v58_v26  ;;  %77 = vst.msk [vmem:[#allocation5] sm:$0xff] %vm31_vm0, %v75_v27 }
 0x145   :  { %v76_v29 = vadd.f32 %v97_v23, %v67_v28 }
 0x147   :  { %78 = vst.msk [vmem:[#allocation5 + $0x8] sm:$0xff] %vm31_vm0, %v76_v29 }
 0x148   :  { %137 = shalt.err (!%p134_p9)
}
 0x149   :  { %90 = dma.vmem_to_hbm [thread:$0]  %s85_s23, 256, %s201_s3, [#allocation4], %s151_s15, %s151_s15, %s152_s16  }
 0x14a   :  { %148 = dma.done.wait [#allocation4], 256  }
 0x14b   :  { %149 = vsyncadd [#allocation4], 4294967040 }
 0x14c   :  { %94 = vsyncpa [#allocation3], 1 }
 0x14d   :  { %95 = vsyncpa [#allocation4], 1 }

</bundles_post_ra>
